<compile_context>
chip_gen: v7x
topology: tpu7x:2x2x1
jax: 0.10.0
libtpu: 0.0.40
codegen_flags: <defaults>
</compile_context>

<pallas_src>
import math
import jax
import jax.numpy as jnp
from jax.experimental import pallas as pl
from jax.experimental.pallas import tpu as pltpu

# ----------------------------- config ---------------------------------------
B = 2            # batch
S = 8            # sequence length
H = 32           # hidden size (reference default 768, scaled down)
FFN = 4 * H      # feed-forward inner dim (128)
C = 3            # num_classes
CPAD = 128       # classifier output padded to full lane width
VOCAB = 50
BS = B * S
# TODO(synk): dropout (self.dropout) only exists when dr_rate is set; with the
# default dr_rate=None the PyTorch forward skips it, so we skip it too.
# TODO(synk): on v7x with realistic batch sizes, add a leading grid axis over
# batch with dimension_semantics=("parallel",) to use both TensorCores and
# re-budget VMEM / tile the FFN weights; at B=2 a single-program kernel is the
# right shape (per-step grid overhead would dominate).

# Column offsets inside the packed bf16 weight slab (H rows).
OFF_W1  = 0                  # (H, FFN)
OFF_WC  = OFF_W1 + FFN       # (H, CPAD)  -- classifier, lane-padded
OFF_QKV = OFF_WC + CPAD      # (H, 3H)    -- fused Q|K|V
OFF_WO  = OFF_QKV + 3 * H    # (H, H)
OFF_WP  = OFF_WO + H         # (H, H)
W_COLS  = OFF_WP + H         # total columns = 416


def _gelu(x):
    c = 0.7978845608028654  # sqrt(2/pi), tanh-approximate BERT GELU
    return 0.5 * x * (1.0 + jnp.tanh(c * (x + 0.044715 * x * x * x)))


def _layernorm(x, gamma, beta, eps=1e-12):
    # two-pass variance (robust vs E[x^2]-mu^2 cancellation); all f32 (v5e-safe)
    mu = jnp.mean(x, axis=-1, keepdims=True)
    var = jnp.mean((x - mu) * (x - mu), axis=-1, keepdims=True)
    return (x - mu) * jax.lax.rsqrt(var + eps) * gamma + beta


# ----------------------------- kernel ---------------------------------------
def bert_classifier_kernel(x_ref, mask_ref, w_ref, w2_ref, vec_ref, out_ref):
    # x_ref   : (B*S, H)      f32 embeddings (residual stream stays f32)
    # mask_ref: (B*S, B*S)    f32 additive attention bias (0 / -1e9)
    # w_ref   : (H, W_COLS)   bf16 packed weights
    # w2_ref  : (FFN, H)      bf16 FFN-down weight, (K, N) layout
    # vec_ref : (5, 128)      f32 packed biases / LayerNorm params
    # out_ref : (B, CPAD)     f32 lane-padded logits
    bf16 = jnp.bfloat16

    # --- static weight views --------------------------------------------------
    w1   = w_ref[:, OFF_W1:OFF_W1 + FFN]
    wc   = w_ref[:, OFF_WC:OFF_WC + CPAD]
    wqkv = w_ref[:, OFF_QKV:OFF_QKV + 3 * H]
    wo   = w_ref[:, OFF_WO:OFF_WO + H]
    wp   = w_ref[:, OFF_WP:OFF_WP + H]
    w2   = w2_ref[...]

    b_qkv = vec_ref[0:1, 0:3 * H]          # (1, 96)
    bo    = vec_ref[0:1, 3 * H:4 * H]      # (1, 32)
    ln1_g = vec_ref[1:2, 0:H]
    ln1_b = vec_ref[1:2, H:2 * H]
    ln2_g = vec_ref[1:2, 2 * H:3 * H]
    ln2_b = vec_ref[1:2, 3 * H:4 * H]
    b1    = vec_ref[2:3, 0:FFN]            # (1, 128)
    b2    = vec_ref[3:4, 0:H]
    bp    = vec_ref[3:4, H:2 * H]
    bc    = vec_ref[4:5, 0:CPAD]           # (1, 128)

    x_f32 = x_ref[...]                      # (B*S, H) f32
    x_bf  = x_f32.astype(bf16)

    # --- fused QKV projection (single 2-D MXU matmul) ---------------------------
    qkv = jnp.dot(x_bf, wqkv, preferred_element_type=jnp.float32) + b_qkv  # (BS, 3H)
    q = qkv[:, 0:H]
    k = qkv[:, H:2 * H]
    v = qkv[:, 2 * H:3 * H]

    # --- flattened single-head self-attention (everything stays 2-D) ------------
    scale = 1.0 / math.sqrt(H)
    scores = jax.lax.dot_general(                       # (BS, BS), contract H
        q.astype(bf16), k.astype(bf16),
        dimension_numbers=(((1,), (1,)), ((), ())),
        preferred_element_type=jnp.float32) * scale
    scores = scores + mask_ref[...]                     # block-diag + valid_length

    m = jnp.max(scores, axis=-1, keepdims=True)
    p = jnp.exp(scores - m)
    # approx reciprocal on the EUP slot; tiny relative error, inference-ok
    p = p * pl.reciprocal(jnp.sum(p, axis=-1, keepdims=True), approx=True)

    ctx = jnp.dot(p.astype(bf16), v.astype(bf16),
                  preferred_element_type=jnp.float32)   # (BS, H)

    attn_out = jnp.dot(ctx.astype(bf16), wo,
                       preferred_element_type=jnp.float32) + bo
    h1 = _layernorm(x_f32 + attn_out, ln1_g, ln1_b)

    # --- feed-forward ------------------------------------------------------------
    ff = _gelu(jnp.dot(h1.astype(bf16), w1,
                       preferred_element_type=jnp.float32) + b1)     # (BS, FFN)
    ff2 = jnp.dot(ff.astype(bf16), w2,
                  preferred_element_type=jnp.float32) + b2           # (BS, H)
    h2 = _layernorm(h1 + ff2, ln2_g, ln2_b)

    # --- BERT pooler: tanh(W_p . CLS) --------------------------------------------
    # CLS rows are 0, S, 2S, ... of the flat slab: static 2-D row slices, no 3-D.
    cls = jnp.concatenate([h2[i * S:i * S + 1, :] for i in range(B)], axis=0)  # (B, H)
    pooled = jnp.tanh(jnp.dot(cls.astype(bf16), wp,
                              preferred_element_type=jnp.float32) + bp)

    # (dropout skipped: dr_rate is None)

    # --- classifier: Linear(hidden_size, num_classes), lane-padded output --------
    logits = jnp.dot(pooled.astype(bf16), wc,
                     preferred_element_type=jnp.float32) + bc        # (B, CPAD)
    out_ref[...] = logits


# ----------------------------- packing (once, outside the call path) ----------
def pack_params(p):
    wc_pad = jnp.pad(p["wc"], ((0, 0), (0, CPAD - C)))
    w_slab = jnp.concatenate(
        [p["w1"], wc_pad, p["wq"], p["wk"], p["wv"], p["wo"], p["wp"]],
        axis=1).astype(jnp.bfloat16)                     # (H, W_COLS)
    assert w_slab.shape == (H, W_COLS)
    w2_slab = p["w2"].astype(jnp.bfloat16)               # (FFN, H), (K,N) layout

    def row(*parts, width=128):
        r = jnp.concatenate([q.reshape(-1) for q in parts])
        return jnp.pad(r, (0, width - r.shape[0]))

    vec_slab = jnp.stack([
        row(p["bq"], p["bk"], p["bv"], p["bo"]),
        row(p["ln1_g"], p["ln1_b"], p["ln2_g"], p["ln2_b"]),
        row(p["b1"]),
        row(p["b2"], p["bp"]),
        row(p["bc"]),
    ]).astype(jnp.float32)                                # (5, 128)
    return w_slab, w2_slab, vec_slab


# ----------------------------- wrapper (jitted) --------------------------------
def _make_mask_bias(valid_length):
    # (B*S, B*S) additive bias: 0 where query-row and key-col belong to the same
    # batch AND the key position is < valid_length[batch]; -1e9 otherwise.
    # Matches gen_attention_mask (mask[i, :valid_length[i]] = 1).
    idx = jnp.arange(BS, dtype=jnp.int32)
    q_batch = idx // S
    k_batch = idx // S
    k_pos = idx % S
    same = q_batch[:, None] == k_batch[None, :]
    valid = k_pos[None, :] < valid_length[k_batch][None, :]
    return jnp.where(same & valid, 0.0, -1e9).astype(jnp.float32)


_COST = pl.CostEstimate(
    flops=2 * (BS * H * 3 * H + BS * H * BS + BS * BS * H + BS * H * H
               + BS * H * FFN + BS * FFN * H + B * H * H + B * H * CPAD),
    transcendentals=BS * BS + BS * FFN + B * H + 2 * BS,
    bytes_accessed=(BS * H * 4 + BS * BS * 4 + H * W_COLS * 2
                    + FFN * H * 2 + 5 * 128 * 4 + B * CPAD * 4),
)


@jax.jit
def bert_classifier_forward(token_ids, valid_length, segment_ids,
                            word_emb, seg_emb, pos_emb,
                            w_slab, w2_slab, vec_slab):
    # plain-JAX glue (fused into the same XLA program by jit):
    # embedding gathers (token + segment + position) and the attention-mask bias.
    x = (word_emb[token_ids]
         + seg_emb[segment_ids]
         + pos_emb[None, :, :]).astype(jnp.float32)                 # (B, S, H)
    x2 = x.reshape(BS, H)                                           # f32 residual
    vlen = valid_length.astype(jnp.int32).reshape(B)
    mask_bias = _make_mask_bias(vlen)                               # (BS, BS)

    vmem = pl.BlockSpec(memory_space=pltpu.MemorySpace.VMEM)

    padded = pl.pallas_call(
        bert_classifier_kernel,
        out_shape=jax.ShapeDtypeStruct((B, CPAD), jnp.float32),
        in_specs=[vmem, vmem, vmem, vmem, vmem],
        out_specs=vmem,
        cost_estimate=_COST,
    )(x2, mask_bias, w_slab, w2_slab, vec_slab)

    return padded[:, :C]                                            # (B, C)


# ----------------------------- params ----------------------------------------
def make_params(key):
    ks = jax.random.split(key, 11)
    std = 0.02

    def nrm(k, shape):
        return (std * jax.random.normal(k, shape)).astype(jnp.float32)

    return {
        "word_emb": nrm(ks[0], (VOCAB, H)),
        "seg_emb":  nrm(ks[1], (2, H)),
        "pos_emb":  nrm(ks[2], (S, H)),
        "wq": nrm(ks[3], (H, H)), "bq": jnp.zeros((H,), jnp.float32),
        "wk": nrm(ks[4], (H, H)), "bk": jnp.zeros((H,), jnp.float32),
        "wv": nrm(ks[5], (H, H)), "bv": jnp.zeros((H,), jnp.float32),
        "wo": nrm(ks[6], (H, H)), "bo": jnp.zeros((H,), jnp.float32),
        "ln1_g": jnp.ones((H,), jnp.float32),
        "ln1_b": jnp.zeros((H,), jnp.float32),
        "w1": nrm(ks[7], (H, FFN)), "b1": jnp.zeros((FFN,), jnp.float32),
        "w2": nrm(ks[8], (FFN, H)), "b2": jnp.zeros((H,), jnp.float32),
        "ln2_g": jnp.ones((H,), jnp.float32),
        "ln2_b": jnp.zeros((H,), jnp.float32),
        "wp": nrm(ks[9], (H, H)),  "bp": jnp.zeros((H,), jnp.float32),
        "wc": nrm(ks[10], (H, C)), "bc": jnp.zeros((C,), jnp.float32),
    }


# ----------------------------- main -------------------------------------------
if __name__ == "__main__":
    key = jax.random.PRNGKey(0)
    k_tok, k_par = jax.random.split(key)

    token_ids = jax.random.randint(k_tok, (B, S), 0, VOCAB, dtype=jnp.int32)
    valid_length = jnp.array([S, S // 2], dtype=jnp.int32)        # (B,)
    segment_ids = jnp.zeros((B, S), dtype=jnp.int32)

    params = make_params(k_par)
    # Pack weights ONCE, outside the (jitted) per-call path.
    w_slab, w2_slab, vec_slab = pack_params(params)
    w_slab, w2_slab, vec_slab = jax.block_until_ready((w_slab, w2_slab, vec_slab))

    logits = bert_classifier_forward(
        token_ids, valid_length, segment_ids,
        params["word_emb"], params["seg_emb"], params["pos_emb"],
        w_slab, w2_slab, vec_slab)
    jax.block_until_ready(logits)
    assert logits.shape == (B, C) and logits.dtype == jnp.float32
    assert bool(jnp.all(jnp.isfinite(logits)))
    print("KERNEL_OK")
</pallas_src>

<mosaic_0001>
module attributes {stable_mosaic.version = 11 : i64} {
  func.func @bert_classifier_kernel(%arg0: memref<16x32xf32, #tpu.memory_space<vmem>>, %arg1: memref<16x16xf32, #tpu.memory_space<vmem>>, %arg2: memref<32x416xbf16, #tpu.memory_space<vmem>>, %arg3: memref<128x32xbf16, #tpu.memory_space<vmem>>, %arg4: memref<5x128xf32, #tpu.memory_space<vmem>>, %arg5: memref<2x128xf32, #tpu.memory_space<vmem>>) attributes {dimension_semantics = [], scalar_prefetch = 0 : i64, scratch_operands = 0 : i64, tpu.core_type = #tpu.core_type<tc>} {
    %c0 = arith.constant 0 : index
    %c0_0 = arith.constant 0 : index
    %0 = vector.load %arg2[%c0, %c0_0] : memref<32x416xbf16, #tpu.memory_space<vmem>>, vector<32x128xbf16>
    %c0_1 = arith.constant 0 : index
    %c128 = arith.constant 128 : index
    %1 = vector.load %arg2[%c0_1, %c128] : memref<32x416xbf16, #tpu.memory_space<vmem>>, vector<32x128xbf16>
    %c0_2 = arith.constant 0 : index
    %c256 = arith.constant 256 : index
    %2 = vector.load %arg2[%c0_2, %c256] : memref<32x416xbf16, #tpu.memory_space<vmem>>, vector<32x96xbf16>
    %c0_3 = arith.constant 0 : index
    %c352 = arith.constant 352 : index
    %3 = vector.load %arg2[%c0_3, %c352] : memref<32x416xbf16, #tpu.memory_space<vmem>>, vector<32x32xbf16>
    %c0_4 = arith.constant 0 : index
    %c384 = arith.constant 384 : index
    %4 = vector.load %arg2[%c0_4, %c384] : memref<32x416xbf16, #tpu.memory_space<vmem>>, vector<32x32xbf16>
    %c0_5 = arith.constant 0 : index
    %c0_6 = arith.constant 0 : index
    %5 = vector.load %arg3[%c0_5, %c0_6] : memref<128x32xbf16, #tpu.memory_space<vmem>>, vector<128x32xbf16>
    %c0_7 = arith.constant 0 : index
    %c0_8 = arith.constant 0 : index
    %6 = vector.load %arg4[%c0_7, %c0_8] : memref<5x128xf32, #tpu.memory_space<vmem>>, vector<1x96xf32>
    %c0_9 = arith.constant 0 : index
    %c96 = arith.constant 96 : index
    %7 = vector.load %arg4[%c0_9, %c96] : memref<5x128xf32, #tpu.memory_space<vmem>>, vector<1x32xf32>
    %c1 = arith.constant 1 : index
    %c0_10 = arith.constant 0 : index
    %8 = vector.load %arg4[%c1, %c0_10] : memref<5x128xf32, #tpu.memory_space<vmem>>, vector<1x32xf32>
    %c1_11 = arith.constant 1 : index
    %c32 = arith.constant 32 : index
    %9 = vector.load %arg4[%c1_11, %c32] : memref<5x128xf32, #tpu.memory_space<vmem>>, vector<1x32xf32>
    %c1_12 = arith.constant 1 : index
    %c64 = arith.constant 64 : index
    %10 = vector.load %arg4[%c1_12, %c64] : memref<5x128xf32, #tpu.memory_space<vmem>>, vector<1x32xf32>
    %c1_13 = arith.constant 1 : index
    %c96_14 = arith.constant 96 : index
    %11 = vector.load %arg4[%c1_13, %c96_14] : memref<5x128xf32, #tpu.memory_space<vmem>>, vector<1x32xf32>
    %c2 = arith.constant 2 : index
    %c0_15 = arith.constant 0 : index
    %12 = vector.load %arg4[%c2, %c0_15] : memref<5x128xf32, #tpu.memory_space<vmem>>, vector<1x128xf32>
    %c3 = arith.constant 3 : index
    %c0_16 = arith.constant 0 : index
    %13 = vector.load %arg4[%c3, %c0_16] : memref<5x128xf32, #tpu.memory_space<vmem>>, vector<1x32xf32>
    %c3_17 = arith.constant 3 : index
    %c32_18 = arith.constant 32 : index
    %14 = vector.load %arg4[%c3_17, %c32_18] : memref<5x128xf32, #tpu.memory_space<vmem>>, vector<1x32xf32>
    %c4 = arith.constant 4 : index
    %c0_19 = arith.constant 0 : index
    %15 = vector.load %arg4[%c4, %c0_19] : memref<5x128xf32, #tpu.memory_space<vmem>>, vector<1x128xf32>
    %c0_20 = arith.constant 0 : index
    %c0_21 = arith.constant 0 : index
    %16 = vector.load %arg0[%c0_20, %c0_21] : memref<16x32xf32, #tpu.memory_space<vmem>>, vector<16x32xf32>
    %17 = arith.truncf %16 : vector<16x32xf32> to vector<16x32xbf16>
    %cst = arith.constant dense<0.000000e+00> : vector<16x96xf32>
    %18 = tpu.matmul %17, %2, %cst {dimension_numbers = #tpu.dot_dimension_numbers<[1], [0], [0], [1], [0, 0, 1, 1], [], []>} : vector<16x32xbf16>, vector<32x96xbf16>, vector<16x96xf32> -> vector<16x96xf32>
    %19 = vector.broadcast %6 : vector<1x96xf32> to vector<16x96xf32>
    %20 = arith.addf %18, %19 : vector<16x96xf32>
    %21 = vector.extract_strided_slice %20 {offsets = [0, 0], sizes = [16, 32], strides = [1, 1]} : vector<16x96xf32> to vector<16x32xf32>
    %22 = vector.extract_strided_slice %20 {offsets = [0, 32], sizes = [16, 32], strides = [1, 1]} : vector<16x96xf32> to vector<16x32xf32>
    %23 = vector.extract_strided_slice %20 {offsets = [0, 64], sizes = [16, 32], strides = [1, 1]} : vector<16x96xf32> to vector<16x32xf32>
    %24 = arith.truncf %21 : vector<16x32xf32> to vector<16x32xbf16>
    %25 = arith.truncf %22 : vector<16x32xf32> to vector<16x32xbf16>
    %cst_22 = arith.constant dense<0.000000e+00> : vector<16x16xf32>
    %26 = tpu.matmul %24, %25, %cst_22 {dimension_numbers = #tpu.dot_dimension_numbers<[1], [1], [0], [0], [0, 0, 1, 0], [], []>} : vector<16x32xbf16>, vector<16x32xbf16>, vector<16x16xf32> -> vector<16x16xf32>
    %cst_23 = arith.constant 0.176776692 : f32
    %27 = vector.broadcast %cst_23 : f32 to vector<16x16xf32>
    %28 = arith.mulf %26, %27 : vector<16x16xf32>
    %c0_24 = arith.constant 0 : index
    %c0_25 = arith.constant 0 : index
    %29 = vector.load %arg1[%c0_24, %c0_25] : memref<16x16xf32, #tpu.memory_space<vmem>>, vector<16x16xf32>
    %30 = arith.addf %28, %29 : vector<16x16xf32>
    %cst_26 = arith.constant dense<0xFF800000> : vector<16xf32>
    %31 = vector.multi_reduction <maximumf>, %30, %cst_26 [1] : vector<16x16xf32> to vector<16xf32>
    %32 = vector.shape_cast %31 : vector<16xf32> to vector<16x1xf32>
    %33 = vector.broadcast %32 : vector<16x1xf32> to vector<16x16xf32>
    %34 = arith.subf %30, %33 : vector<16x16xf32>
    %35 = math.exp %34 : vector<16x16xf32>
    %cst_27 = arith.constant dense<0.000000e+00> : vector<16xf32>
    %36 = vector.multi_reduction <add>, %35, %cst_27 [1] : vector<16x16xf32> to vector<16xf32>
    %37 = vector.shape_cast %36 : vector<16xf32> to vector<16x1xf32>
    %38 = tpu.reciprocal %37 {approx = true} : vector<16x1xf32> -> vector<16x1xf32>
    %39 = vector.broadcast %38 : vector<16x1xf32> to vector<16x16xf32>
    %40 = arith.mulf %35, %39 : vector<16x16xf32>
    %41 = arith.truncf %40 : vector<16x16xf32> to vector<16x16xbf16>
    %42 = arith.truncf %23 : vector<16x32xf32> to vector<16x32xbf16>
    %cst_28 = arith.constant dense<0.000000e+00> : vector<16x32xf32>
    %43 = tpu.matmul %41, %42, %cst_28 {dimension_numbers = #tpu.dot_dimension_numbers<[1], [0], [0], [1], [0, 0, 1, 1], [], []>} : vector<16x16xbf16>, vector<16x32xbf16>, vector<16x32xf32> -> vector<16x32xf32>
    %44 = arith.truncf %43 : vector<16x32xf32> to vector<16x32xbf16>
    %cst_29 = arith.constant dense<0.000000e+00> : vector<16x32xf32>
    %45 = tpu.matmul %44, %3, %cst_29 {dimension_numbers = #tpu.dot_dimension_numbers<[1], [0], [0], [1], [0, 0, 1, 1], [], []>} : vector<16x32xbf16>, vector<32x32xbf16>, vector<16x32xf32> -> vector<16x32xf32>
    %46 = vector.broadcast %7 : vector<1x32xf32> to vector<16x32xf32>
    %47 = arith.addf %45, %46 : vector<16x32xf32>
    %48 = arith.addf %16, %47 : vector<16x32xf32>
    %cst_30 = arith.constant dense<0.000000e+00> : vector<16xf32>
    %49 = vector.multi_reduction <add>, %48, %cst_30 [1] : vector<16x32xf32> to vector<16xf32>
    %50 = vector.shape_cast %49 : vector<16xf32> to vector<16x1xf32>
    %cst_31 = arith.constant 3.200000e+01 : f32
    %51 = vector.broadcast %cst_31 : f32 to vector<16x1xf32>
    %52 = arith.divf %50, %51 : vector<16x1xf32>
    %53 = vector.broadcast %52 : vector<16x1xf32> to vector<16x32xf32>
    %54 = arith.subf %48, %53 : vector<16x32xf32>
    %55 = vector.broadcast %52 : vector<16x1xf32> to vector<16x32xf32>
    %56 = arith.subf %48, %55 : vector<16x32xf32>
    %57 = arith.mulf %54, %56 : vector<16x32xf32>
    %cst_32 = arith.constant dense<0.000000e+00> : vector<16xf32>
    %58 = vector.multi_reduction <add>, %57, %cst_32 [1] : vector<16x32xf32> to vector<16xf32>
    %59 = vector.shape_cast %58 : vector<16xf32> to vector<16x1xf32>
    %cst_33 = arith.constant 3.200000e+01 : f32
    %60 = vector.broadcast %cst_33 : f32 to vector<16x1xf32>
    %61 = arith.divf %59, %60 : vector<16x1xf32>
    %62 = vector.broadcast %52 : vector<16x1xf32> to vector<16x32xf32>
    %63 = arith.subf %48, %62 : vector<16x32xf32>
    %cst_34 = arith.constant 9.99999996E-13 : f32
    %64 = vector.broadcast %cst_34 : f32 to vector<16x1xf32>
    %65 = arith.addf %61, %64 : vector<16x1xf32>
    %66 = math.rsqrt %65 : vector<16x1xf32>
    %67 = vector.broadcast %66 : vector<16x1xf32> to vector<16x32xf32>
    %68 = arith.mulf %63, %67 : vector<16x32xf32>
    %69 = vector.broadcast %8 : vector<1x32xf32> to vector<16x32xf32>
    %70 = arith.mulf %68, %69 : vector<16x32xf32>
    %71 = vector.broadcast %9 : vector<1x32xf32> to vector<16x32xf32>
    %72 = arith.addf %70, %71 : vector<16x32xf32>
    %73 = arith.truncf %72 : vector<16x32xf32> to vector<16x32xbf16>
    %cst_35 = arith.constant dense<0.000000e+00> : vector<16x128xf32>
    %74 = tpu.matmul %73, %0, %cst_35 {dimension_numbers = #tpu.dot_dimension_numbers<[1], [0], [0], [1], [0, 0, 1, 1], [], []>} : vector<16x32xbf16>, vector<32x128xbf16>, vector<16x128xf32> -> vector<16x128xf32>
    %75 = vector.broadcast %12 : vector<1x128xf32> to vector<16x128xf32>
    %76 = arith.addf %74, %75 : vector<16x128xf32>
    %cst_36 = arith.constant 5.000000e-01 : f32
    %77 = vector.broadcast %cst_36 : f32 to vector<16x128xf32>
    %78 = arith.mulf %77, %76 : vector<16x128xf32>
    %cst_37 = arith.constant 4.471500e-02 : f32
    %79 = vector.broadcast %cst_37 : f32 to vector<16x128xf32>
    %80 = arith.mulf %79, %76 : vector<16x128xf32>
    %81 = arith.mulf %80, %76 : vector<16x128xf32>
    %82 = arith.mulf %81, %76 : vector<16x128xf32>
    %83 = arith.addf %76, %82 : vector<16x128xf32>
    %cst_38 = arith.constant 0.797884583 : f32
    %84 = vector.broadcast %cst_38 : f32 to vector<16x128xf32>
    %85 = arith.mulf %84, %83 : vector<16x128xf32>
    %86 = math.tanh %85 : vector<16x128xf32>
    %cst_39 = arith.constant 1.000000e+00 : f32
    %87 = vector.broadcast %cst_39 : f32 to vector<16x128xf32>
    %88 = arith.addf %87, %86 : vector<16x128xf32>
    %89 = arith.mulf %78, %88 : vector<16x128xf32>
    %90 = arith.truncf %89 : vector<16x128xf32> to vector<16x128xbf16>
    %cst_40 = arith.constant dense<0.000000e+00> : vector<16x32xf32>
    %91 = tpu.matmul %90, %5, %cst_40 {dimension_numbers = #tpu.dot_dimension_numbers<[1], [0], [0], [1], [0, 0, 1, 1], [], []>} : vector<16x128xbf16>, vector<128x32xbf16>, vector<16x32xf32> -> vector<16x32xf32>
    %92 = vector.broadcast %13 : vector<1x32xf32> to vector<16x32xf32>
    %93 = arith.addf %91, %92 : vector<16x32xf32>
    %94 = arith.addf %72, %93 : vector<16x32xf32>
    %cst_41 = arith.constant dense<0.000000e+00> : vector<16xf32>
    %95 = vector.multi_reduction <add>, %94, %cst_41 [1] : vector<16x32xf32> to vector<16xf32>
    %96 = vector.shape_cast %95 : vector<16xf32> to vector<16x1xf32>
    %cst_42 = arith.constant 3.200000e+01 : f32
    %97 = vector.broadcast %cst_42 : f32 to vector<16x1xf32>
    %98 = arith.divf %96, %97 : vector<16x1xf32>
    %99 = vector.broadcast %98 : vector<16x1xf32> to vector<16x32xf32>
    %100 = arith.subf %94, %99 : vector<16x32xf32>
    %101 = vector.broadcast %98 : vector<16x1xf32> to vector<16x32xf32>
    %102 = arith.subf %94, %101 : vector<16x32xf32>
    %103 = arith.mulf %100, %102 : vector<16x32xf32>
    %cst_43 = arith.constant dense<0.000000e+00> : vector<16xf32>
    %104 = vector.multi_reduction <add>, %103, %cst_43 [1] : vector<16x32xf32> to vector<16xf32>
    %105 = vector.shape_cast %104 : vector<16xf32> to vector<16x1xf32>
    %cst_44 = arith.constant 3.200000e+01 : f32
    %106 = vector.broadcast %cst_44 : f32 to vector<16x1xf32>
    %107 = arith.divf %105, %106 : vector<16x1xf32>
    %108 = vector.broadcast %98 : vector<16x1xf32> to vector<16x32xf32>
    %109 = arith.subf %94, %108 : vector<16x32xf32>
    %cst_45 = arith.constant 9.99999996E-13 : f32
    %110 = vector.broadcast %cst_45 : f32 to vector<16x1xf32>
    %111 = arith.addf %107, %110 : vector<16x1xf32>
    %112 = math.rsqrt %111 : vector<16x1xf32>
    %113 = vector.broadcast %112 : vector<16x1xf32> to vector<16x32xf32>
    %114 = arith.mulf %109, %113 : vector<16x32xf32>
    %115 = vector.broadcast %10 : vector<1x32xf32> to vector<16x32xf32>
    %116 = arith.mulf %114, %115 : vector<16x32xf32>
    %117 = vector.broadcast %11 : vector<1x32xf32> to vector<16x32xf32>
    %118 = arith.addf %116, %117 : vector<16x32xf32>
    %119 = vector.extract_strided_slice %118 {offsets = [0, 0], sizes = [1, 32], strides = [1, 1]} : vector<16x32xf32> to vector<1x32xf32>
    %120 = vector.extract_strided_slice %118 {offsets = [8, 0], sizes = [1, 32], strides = [1, 1]} : vector<16x32xf32> to vector<1x32xf32>
    %121 = tpu.concatenate %119, %120 in 0 : vector<1x32xf32>, vector<1x32xf32> -> vector<2x32xf32>
    %122 = arith.truncf %121 : vector<2x32xf32> to vector<2x32xbf16>
    %cst_46 = arith.constant dense<0.000000e+00> : vector<2x32xf32>
    %123 = tpu.matmul %122, %4, %cst_46 {dimension_numbers = #tpu.dot_dimension_numbers<[1], [0], [0], [1], [0, 0, 1, 1], [], []>} : vector<2x32xbf16>, vector<32x32xbf16>, vector<2x32xf32> -> vector<2x32xf32>
    %124 = vector.broadcast %14 : vector<1x32xf32> to vector<2x32xf32>
    %125 = arith.addf %123, %124 : vector<2x32xf32>
    %126 = math.tanh %125 : vector<2x32xf32>
    %127 = arith.truncf %126 : vector<2x32xf32> to vector<2x32xbf16>
    %cst_47 = arith.constant dense<0.000000e+00> : vector<2x128xf32>
    %128 = tpu.matmul %127, %1, %cst_47 {dimension_numbers = #tpu.dot_dimension_numbers<[1], [0], [0], [1], [0, 0, 1, 1], [], []>} : vector<2x32xbf16>, vector<32x128xbf16>, vector<2x128xf32> -> vector<2x128xf32>
    %129 = vector.broadcast %15 : vector<1x128xf32> to vector<2x128xf32>
    %130 = arith.addf %128, %129 : vector<2x128xf32>
    %c0_48 = arith.constant 0 : index
    %c0_49 = arith.constant 0 : index
    %131 = vector.load %arg5[%c0_48, %c0_49] : memref<2x128xf32, #tpu.memory_space<vmem>>, vector<2x128xf32>
    tpu.vector_store %arg5[%c0_48, %c0_49], %130 {strides = array<i32>} : memref<2x128xf32, #tpu.memory_space<vmem>>, vector<2x128xf32>,
    return
  }
}

</mosaic_0001>

<bundles_post_ra>
// kernel: bert_classifier_forward.1
= control target key start
LH: loop header
LB: loop body
LE: loop exit
PB: predicated region body
PF: predicated region fallthrough
CT: control target
= control target key end

     0   :  { %v895_v0 = vmov 0.0   ;;  %vm896_vm0 = vmmov 0   ;;  %vm78_vm1 = vcmask 261120   ;;  %s1114_s0 = inlined_call_operand.vmem [shape: f32[16,32], index: 0, kind: input, shape index: {}]   ;;  %s1115_s1 = inlined_call_operand.vmem [shape: f32[16,16], index: 1, kind: input, shape index: {}]   ;;  %s1116_s2 = inlined_call_operand.vmem [shape: bf16[32,416], index: 2, kind: input, shape index: {}]   ;;  %s1117_s3 = inlined_call_operand.vmem [shape: bf16[128,32], index: 3, kind: input, shape index: {}]   ;;  %s1118_s4 = inlined_call_operand.vmem [shape: f32[5,128], index: 4, kind: input, shape index: {}]   ;;  %s1119_s5 = inlined_call_operand.hbm [shape: f32[2,128], index: 5, kind: output, shape index: {}]  }
   0x1   :  { %755 = vmatprep.subr.bf16.mxu0 %v895_v0  ;;  %v935_v1 = vld [vmem:[%s1116_s2 + $0x8] ss:$16 sps:$4 sm:$0xff]   ;;  %759 = vmatprep.mubr.msk.bf16.mxu0 %vm896_vm0, %v895_v0  ;;  %v947_v3 = vld [vmem:[%s1114_s0] sm:$0xff] }
   0x2   :  { %v942_v2 = vld [vmem:[%s1116_s2 + $0x28] ss:$16 sps:$4 sm:$0xff]   ;;  %763 = vmatprep.subr.bf16.mxu1 %v895_v0  ;;  %765 = vmatprep.mubr.msk.bf16.mxu1 %vm896_vm0, %v895_v0 }
   0x3   :  { %756 = vmatpush3.bf16.msra.mxu0 %v935_v1  ;;  %v956_v4 = vld [vmem:[%s1114_s0 + $0x8] sm:$0xff] }
   0x4   :  { %757 = vmatprep.subr.bf16.mxu0 %v895_v0  ;;  %v61_v5 = vpack.c.bf16 %v956_v4, %v947_v3 }
   0x7   :  { %758 = vmatpush3.bf16.msra.mxu0 %v942_v2 }
   0x8   :  { %769 = vmatprep.subr.bf16.mxu0 %v895_v0 }
   0xa   :  { %760 = vmatmul.mubr.msk.bf16.vlgmr.msra.gmra.mrb[0].mxu0 %vm78_vm1, %v61_v5 }
   0xb   :  { %771 = vmatprep.mubr.msk.bf16.mxu0 %vm896_vm0, %v895_v0 }
   0xc   :  { %10 = vsyncpa [#allocation3], 0  ;;  %v699_v6 = vld [vmem:[%s1118_s4] ss:$0 sm:$0xff]  ;;  %s897_s0 = smov 96   ;;  %vm180_vm2 = vcmask 130048  }
   0xd   :  { %v176_v17 = vld [vmem:[%s1115_s1] sm:$0xff]  ;;  %v177_v21 = vld [vmem:[%s1115_s1 + $0x8] sm:$0xff]  ;;  %s898_s1 = smov 64   ;;  %s899_s7 = smov 32   ;;  %vm561_vm3 = vcmask 1040384  }
   0xe   :  { %s900_s16 = smov [#allocation2]  }
   0xf   :  { %s691_s17 = sshll.u32 %s900_s16, 4  ;;  %s692_s17 = int_to_ptr.vmem [resolvable:$true] %s691_s17 }
  0x10   :  { %p876_p1 = scmp.lt.s32.totalorder %s692_s17, %s692_s17 }
  0xdd   :  { %v116_v7 = vpop.f32.mrb[0].mxu0 }
  0xde   :  { %v761_v8 = vpop.f32.mrb[1].mxu0  ;;  %v117_v10 = vadd.f32 %v699_v6, %v116_v7 }
  0xdf   :  { %v119_v9 = vpop.f32.mrb[2].mxu0 }
  0xe0   :  { %v120_v11 = vadd.f32 %v699_v6, %v119_v9  ;;  %v762_v12 = vpop.f32.mrb[3].mxu0 }
  0xe1   :  { %v835_v12 = vld [vmem:[%s1116_s2] ss:$16 sps:$4 sm:$0xff]  }
  0xe2   :  { %v123_v13 = vpack.c.bf16 %v120_v11, %v117_v10 }
  0xe4   :  { %125 = vrot.lane.b32.xlu0 %v123_v13, %s897_s0 }
 0x156   :  { %v126_v14 = vpop.permute.xlu0 %125 }
 0x157   :  { %v131_v15 = vsel %vm78_vm1, %v126_v14, 0 }
 0x158   :  { %764 = vmatpush3.bf16.xpose.msra.mxu1 %v131_v15 }
 0x159   :  { %775 = vmatprep.subr.bf16.mxu1 %v895_v0 }
 0x15f   :  { %766 = vmatmul.mubr.msk.bf16.vlgmr.msra.gmra.mrb[0].mxu1 %vm78_vm1, %v123_v13 }
 0x160   :  { %779 = vmatprep.mubr.msk.bf16.mxu1 %vm896_vm0, %v895_v0 }
 0x232   :  { %v167_v16 = vpop.f32.mrb[0].mxu1 }
 0x233   :  { %v174_v18 = vmul.f32 0.17677669, %v167_v16  ;;  %v767_v19 = vpop.f32.mrb[1].mxu1 }
 0x234   :  { %v170_v20 = vpop.f32.mrb[2].mxu1 }
 0x235   :  { %v175_v22 = vmul.f32 0.17677669, %v170_v20  ;;  %v768_v23 = vpop.f32.mrb[3].mxu1  ;;  %v178_v24 = vadd.f32 %v176_v17, %v174_v18 }
 0x237   :  { %v181_v25 = vsel %vm180_vm2, %v178_v24, -inf  ;;  %v179_v26 = vadd.f32 %v177_v21, %v175_v22 }
 0x238   :  { %182 = vmax.xlane.f32.xlu0 %v181_v25 }
 0x239   :  { %v184_v27 = vsel %vm180_vm2, %v179_v26, -inf }
 0x23a   :  { %185 = vmax.xlane.f32.xlu1 %v184_v27 }
 0x24e   :  { %259 = vrot.lane.b32.xlu0 %v699_v6, %s899_s7 }
 0x2c5   :  { %v183_v28 = vpop.xlane.xlu0 %182 }
 0x2c6   :  { %v187_v29 = vsub.f32 %v178_v24, %v183_v28 }
 0x2c7   :  { %v186_v30 = vpop.xlane.xlu1 %185 }
 0x2c8   :  { %v189_v31 = vmul.f32 1.442695, %v187_v29  ;;  %v188_v32 = vsub.f32 %v179_v26, %v186_v30  ;;  %v837_v30 = vld [vmem:[%s1117_s3] sm:$0xff]  }
 0x2c9   :  { %v260_v53 = vpop.permute.xlu0 %259 }
 0x2ca   :  { %849 = vpow2.f32 %v189_v31  ;;  %v191_v33 = vmul.f32 1.442695, %v188_v32  ;;  %v838_v31 = vld [vmem:[%s1117_s3 + $0x8] sm:$0xff]   ;;  %v839_v32 = vld [vmem:[%s1117_s3 + $0x10] sm:$0xff]  }
 0x2cc   :  { %851 = vpow2.f32 %v191_v33  ;;  %v840_v33 = vld [vmem:[%s1117_s3 + $0x18] sm:$0xff]  }
 0x2d4   :  { %v850_v34 = vpop.eup %849 }
 0x2d5   :  { %v193_v35 = vsel %vm180_vm2, %v850_v34, 0.0 }
 0x2d6   :  { %v852_v36 = vpop.eup %851  ;;  %194 = vadd.xlane.f32.xlu1 %v193_v35  ;;  %v842_v35 = vld [vmem:[%s1117_s3 + $0x28] sm:$0xff]  }
 0x2d7   :  { %v196_v37 = vsel %vm180_vm2, %v852_v36, 0.0 }
 0x2da   :  { %197 = vadd.xlane.f32.xlu1 %v196_v37  ;;  %v844_v37 = vld [vmem:[%s1117_s3 + $0x38] sm:$0xff]  }
 0x2eb   :  { %204 = vrot.lane.b32.xlu1 %v123_v13, %s898_s1  ;;  %v836_v13 = vld [vmem:[%s1116_s2 + $0x20] ss:$16 sps:$4 sm:$0xff]  }
 0x2ef   :  { %252 = vrot.lane.b32.xlu1 %v935_v1, %s899_s7 }
 0x2f3   :  { %254 = vrot.lane.b32.xlu1 %v942_v2, %s899_s7 }
 0x363   :  { %v195_v38 = vpop.xlane.xlu1 %194 }
 0x364   :  { %853 = vrcp.f32 %v195_v38  ;;  %v707_v38 = vld [vmem:[%s1118_s4 + $0x2] ss:$0 sm:$0xff] }
 0x367   :  { %v198_v39 = vpop.xlane.xlu1 %197 }
 0x368   :  { %855 = vrcp.f32 %v198_v39 }
 0x36b   :  { %v205_v40 = vpop.permute.xlu1 %204 }
 0x36c   :  { %770 = vmatpush3.bf16.msra.mxu0 %v205_v40 }
 0x36d   :  { %783 = vmatprep.subr.bf16.mxu0 %v895_v0 }
 0x36e   :  { %v854_v42 = vpop.eup %853 }
 0x36f   :  { %v253_v41 = vpop.permute.xlu1 %252  ;;  %v201_v44 = vmul.f32 %v854_v42, %v850_v34  ;;  %v841_v34 = vld [vmem:[%s1117_s3 + $0x20] sm:$0xff]  }
 0x370   :  { %776 = vmatpush3.bf16.msra.mxu1 %v253_v41 }
 0x371   :  { %777 = vmatprep.subr.bf16.mxu1 %v895_v0 }
 0x372   :  { %v856_v43 = vpop.eup %855 }
 0x373   :  { %v202_v45 = vmul.f32 %v856_v43, %v852_v36  ;;  %v255_v46 = vpop.permute.xlu1 %254  ;;  %v843_v36 = vld [vmem:[%s1117_s3 + $0x30] sm:$0xff]  }
 0x374   :  { %778 = vmatpush3.bf16.msra.mxu1 %v255_v46 }
 0x375   :  { %v203_v47 = vpack.c.bf16 %v202_v45, %v201_v44  ;;  %791 = vmatprep.subr.bf16.mxu1 %v895_v0 }
 0x377   :  { %772 = vmatmul.mubr.msk.bf16.vlgmr.msra.gmra.mrb[4].mxu0 %vm180_vm2, %v203_v47 }
 0x378   :  { %787 = vmatprep.mubr.msk.bf16.mxu0 %vm896_vm0, %v895_v0  ;;  %784 = vmatpush3.bf16.msra.mxu0 %v835_v12 }
 0x379   :  { %785 = vmatprep.subr.bf16.mxu0 %v895_v0 }
 0x37c   :  { %786 = vmatpush3.bf16.msra.mxu0 %v836_v13 }
 0x37d   :  { %811 = vmatprep.subr.bf16.mxu0 %v895_v0 }
 0x44a   :  { %v244_v48 = vpop.f32.mrb[4].mxu0 }
 0x44b   :  { %v773_v49 = vpop.f32.mrb[5].mxu0 }
 0x44c   :  { %v247_v50 = vpop.f32.mrb[6].mxu0 }
 0x44d   :  { %v251_v51 = vpack.c.bf16 %v247_v50, %v244_v48  ;;  %v774_v52 = vpop.f32.mrb[7].mxu0 }
 0x44f   :  { %780 = vmatmul.mubr.msk.bf16.vlgmr.msra.gmra.mrb[4].mxu1 %vm78_vm1, %v251_v51 }
 0x450   :  { %807 = vmatprep.mubr.msk.bf16.mxu1 %vm896_vm0, %v895_v0  ;;  %792 = vmatpush3.bf16.msra.mxu1 %v837_v30 }
 0x451   :  { %793 = vmatprep.subr.bf16.mxu1 %v895_v0 }
 0x454   :  { %794 = vmatpush3.bf16.msra.mxu1 %v838_v31 }
 0x455   :  { %795 = vmatprep.subr.bf16.mxu1 %v895_v0 }
 0x458   :  { %796 = vmatpush3.bf16.msra.mxu1 %v839_v32 }
 0x459   :  { %797 = vmatprep.subr.bf16.mxu1 %v895_v0 }
 0x45c   :  { %798 = vmatpush3.bf16.msra.mxu1 %v840_v33 }
 0x45d   :  { %799 = vmatprep.subr.bf16.mxu1 %v895_v0 }
 0x460   :  { %800 = vmatpush3.bf16.msra.mxu1 %v841_v34 }
 0x461   :  { %801 = vmatprep.subr.bf16.mxu1 %v895_v0 }
 0x464   :  { %802 = vmatpush3.bf16.msra.mxu1 %v842_v35 }
 0x465   :  { %803 = vmatprep.subr.bf16.mxu1 %v895_v0 }
 0x468   :  { %804 = vmatpush3.bf16.msra.mxu1 %v843_v36 }
 0x469   :  { %805 = vmatprep.subr.bf16.mxu1 %v895_v0 }
 0x46c   :  { %806 = vmatpush3.bf16.msra.mxu1 %v844_v37 }
 0x522   :  { %v299_v54 = vpop.f32.mrb[4].mxu1 }
 0x523   :  { %v300_v55 = vadd.f32 %v299_v54, %v260_v53  ;;  %v781_v56 = vpop.f32.mrb[5].mxu1 }
 0x524   :  { %v302_v57 = vpop.f32.mrb[6].mxu1 }
 0x525   :  { %v303_v58 = vadd.f32 %v302_v57, %v260_v53  ;;  %v782_v59 = vpop.f32.mrb[7].mxu1  ;;  %v306_v60 = vadd.f32 %v300_v55, %v947_v3 }
 0x527   :  { %v308_v61 = vsel %vm78_vm1, %v306_v60, 0.0  ;;  %v307_v62 = vadd.f32 %v303_v58, %v956_v4  ;;  %v1009_v4 = vld [vmem:[%s1118_s4 + $0x1] ss:$0 sm:$0xff] }
 0x528   :  { %309 = vadd.xlane.f32.xlu1 %v308_v61 }
 0x529   :  { %v311_v63 = vsel %vm78_vm1, %v307_v62, 0.0 }
 0x52a   :  { %312 = vadd.xlane.f32.xlu0 %v311_v63 }
 0x5b5   :  { %v310_v1 = vpop.xlane.xlu1 %309 }
 0x5b6   :  { %v315_v2 = vmul.f32 0.03125, %v310_v1  ;;  %v711_v1 = vld [vmem:[%s1118_s4 + $0x3] ss:$0 sm:$0xff] }
 0x5b7   :  { %v313_v5 = vpop.xlane.xlu0 %312 }
 0x5b8   :  { %v317_v6 = vsub.f32 %v306_v60, %v315_v2  ;;  %v316_v7 = vmul.f32 0.03125, %v313_v5 }
 0x5ba   :  { %v318_v8 = vsub.f32 %v307_v62, %v316_v7  ;;  %v319_v9 = vmul.f32 %v317_v6, %v317_v6 }
 0x5bc   :  { %v321_v10 = vsel %vm78_vm1, %v319_v9, 0.0  ;;  %v320_v11 = vmul.f32 %v318_v8, %v318_v8 }
 0x5bd   :  { %322 = vadd.xlane.f32.xlu1 %v321_v10 }
 0x5be   :  { %v324_v3 = vsel %vm78_vm1, %v320_v11, 0.0 }
 0x5c1   :  { %325 = vadd.xlane.f32.xlu1 %v324_v3 }
 0x5d2   :  { %342 = vrot.lane.b32.xlu1 %v1009_v4, %s897_s0 }
 0x64a   :  { %v323_v14 = vpop.xlane.xlu1 %322 }
 0x64b   :  { %v327_v15 = vmul.f32 0.03125, %v323_v14 }
 0x64d   :  { %v329_v16 = vadd.f32 1e-12, %v327_v15 }
 0x64e   :  { %v326_v17 = vpop.xlane.xlu1 %325 }
 0x64f   :  { %857 = vrsqrt.f32 %v329_v16  ;;  %v328_v18 = vmul.f32 0.03125, %v326_v17 }
 0x651   :  { %v330_v19 = vadd.f32 1e-12, %v328_v18 }
 0x652   :  { %v343_v25 = vpop.permute.xlu1 %342 }
 0x653   :  { %859 = vrsqrt.f32 %v330_v19 }
 0x659   :  { %v858_v20 = vpop.eup %857 }
 0x65a   :  { %v333_v21 = vmul.f32 %v858_v20, %v317_v6 }
 0x65c   :  { %v339_v24 = vmul.f32 %v1009_v4, %v333_v21 }
 0x65d   :  { %v860_v22 = vpop.eup %859 }
 0x65e   :  { %v334_v23 = vmul.f32 %v860_v22, %v318_v8  ;;  %v1023_v27 = vadd.f32 %v343_v25, %v339_v24  ;;  %v846_v24 = vld [vmem:[%s1116_s2 + $0x2c] ss:$16 sps:$4 sm:$0xff]  }
 0x660   :  { %v340_v26 = vmul.f32 %v1009_v4, %v334_v23  ;;  %v845_v23 = vld [vmem:[%s1116_s2 + $0xc] ss:$16 sps:$4 sm:$0xff]  }
 0x662   :  { %v1025_v28 = vadd.f32 %v343_v25, %v340_v26 }
 0x664   :  { %v347_v29 = vpack.c.bf16 %v1025_v28, %v1023_v27 }
 0x666   :  { %788 = vmatmul.mubr.msk.bf16.vlgmr.msra.gmra.mrb[8].mxu0 %vm78_vm1, %v347_v29 }
 0x667   :  { %815 = vmatprep.mubr.msk.bf16.mxu0 %vm896_vm0, %v895_v0  ;;  %812 = vmatpush3.bf16.msra.mxu0 %v845_v23 }
 0x668   :  { %813 = vmatprep.subr.bf16.mxu0 %v895_v0 }
 0x66b   :  { %814 = vmatpush3.bf16.msra.mxu0 %v846_v24 }
 0x66c   :  { %819 = vmatprep.subr.bf16.mxu0 %v895_v0 }
 0x739   :  { %v401_v39 = vpop.f32.mrb[8].mxu0 }
 0x73a   :  { %v402_v40 = vadd.f32 %v707_v38, %v401_v39  ;;  %v789_v41 = vpop.f32.mrb[9].mxu0 }
 0x73b   :  { %v404_v42 = vpop.f32.mrb[10].mxu0 }
 0x73c   :  { %v410_v43 = vmul.f32 0.044715, %v402_v40  ;;  %v405_v44 = vadd.f32 %v707_v38, %v404_v42  ;;  %v790_v45 = vpop.f32.mrb[11].mxu0  ;;  %v408_v58 = vmul.f32 0.5, %v402_v40 }
 0x73e   :  { %v412_v46 = vmul.f32 %v410_v43, %v402_v40  ;;  %v411_v47 = vmul.f32 0.044715, %v405_v44  ;;  %v409_v59 = vmul.f32 0.5, %v405_v44  ;;  %v847_v43 = vld [vmem:[%s1116_s2 + $0x4] ss:$16 sps:$4 sm:$0xff]  }
 0x740   :  { %v414_v48 = vmul.f32 %v412_v46, %v402_v40  ;;  %v413_v49 = vmul.f32 %v411_v47, %v405_v44 }
 0x742   :  { %v416_v50 = vadd.f32 %v414_v48, %v402_v40  ;;  %v415_v51 = vmul.f32 %v413_v49, %v405_v44 }
 0x744   :  { %v418_v52 = vmul.f32 0.7978846, %v416_v50  ;;  %v417_v53 = vadd.f32 %v415_v51, %v405_v44  ;;  %v848_v44 = vld [vmem:[%s1116_s2 + $0x24] ss:$16 sps:$4 sm:$0xff]   ;;  %s871_s2 = scalar_lea.vmem %s692_s17, 32 }
 0x745   :  { %p872_p0 = scmp.ne.s32.totalorder %s692_s17, %s871_s2  ;;  %p877_p2 = scmp.lt.s32.totalorder %s871_s2, %s871_s2 }
 0x746   :  { %861 = vtanh.f32 %v418_v52  ;;  %v419_v54 = vmul.f32 0.7978846, %v417_v53 }
 0x747   :  { %p878_p3 = por %p877_p2, %p876_p1 }
 0x748   :  { %863 = vtanh.f32 %v419_v54 }
 0x749   :  { %p879_p4 = pnand %p878_p3, %p872_p0 }
 0x750   :  { %v862_v55 = vpop.eup %861 }
 0x751   :  { %v422_v56 = vadd.f32 1.0, %v862_v55 }
 0x752   :  { %v864_v57 = vpop.eup %863 }
 0x753   :  { %v423_v60 = vadd.f32 1.0, %v864_v57  ;;  %v424_v61 = vmul.f32 %v422_v56, %v408_v58 }
 0x755   :  { %v425_v62 = vmul.f32 %v423_v60, %v409_v59 }
 0x757   :  { %v426_v63 = vpack.c.bf16 %v425_v62, %v424_v61 }
 0x759   :  { %808 = vmatmul.mubr.bf16.vlgmr.msra.gmra.mrb[8].mxu1 %v426_v63 }
 0x82c   :  { %v513_v2 = vpop.f32.mrb[8].mxu1 }
 0x82d   :  { %v809_v5 = vpop.f32.mrb[9].mxu1  ;;  %v514_v7 = vadd.f32 %v711_v1, %v513_v2 }
 0x82e   :  { %v516_v6 = vpop.f32.mrb[10].mxu1 }
 0x82f   :  { %v517_v8 = vadd.f32 %v711_v1, %v516_v6  ;;  %v810_v9 = vpop.f32.mrb[11].mxu1  ;;  %v520_v3 = vadd.f32 %v514_v7, %v1023_v27 }
 0x831   :  { %v521_v10 = vadd.f32 %v517_v8, %v1025_v28  ;;  %v522_v12 = vsel %vm78_vm1, %v520_v3, 0.0 }
 0x833   :  { %v525_v11 = vsel %vm78_vm1, %v521_v10, 0.0 }
 0x834   :  { %526 = vadd.xlane.f32.xlu0 %v525_v11 }
 0x838   :  { %523 = vadd.xlane.f32.xlu0 %v522_v12 }
 0x8c1   :  { %v527_v13 = vpop.xlane.xlu0 %526 }
 0x8c2   :  { %v529_v14 = vmul.f32 0.03125, %v527_v13 }
 0x8c4   :  { %v531_v15 = vsub.f32 %v521_v10, %v529_v14 }
 0x8c5   :  { %v524_v16 = vpop.xlane.xlu0 %523 }
 0x8c6   :  { %v528_v17 = vmul.f32 0.03125, %v524_v16  ;;  %v533_v18 = vmul.f32 %v531_v15, %v531_v15 }
 0x8c8   :  { %v530_v19 = vsub.f32 %v520_v3, %v528_v17  ;;  %v537_v20 = vsel %vm78_vm1, %v533_v18, 0.0 }
 0x8c9   :  { %538 = vadd.xlane.f32.xlu0 %v537_v20 }
 0x8ca   :  { %v532_v21 = vmul.f32 %v530_v19, %v530_v19 }
 0x8cc   :  { %v534_v22 = vsel %vm78_vm1, %v532_v21, 0.0 }
 0x8cd   :  { %535 = vadd.xlane.f32.xlu1 %v534_v22 }
 0x8df   :  { %548 = vrot.lane.b32.xlu0 %v1009_v4, %s898_s1 }
 0x8e3   :  { %553 = vrot.lane.b32.xlu0 %v1009_v4, %s899_s7 }
 0x8e7   :  { %577 = vrot.lane.b32.xlu0 %v711_v1, %s897_s0 }
 0x956   :  { %v539_v25 = vpop.xlane.xlu0 %538 }
 0x957   :  { %v541_v26 = vmul.f32 0.03125, %v539_v25 }
 0x959   :  { %v543_v27 = vadd.f32 1e-12, %v541_v26 }
 0x95a   :  { %v536_v4 = vpop.xlane.xlu1 %535  ;;  %v549_v30 = vpop.permute.xlu0 %548 }
 0x95b   :  { %865 = vrsqrt.f32 %v543_v27  ;;  %v540_v28 = vmul.f32 0.03125, %v536_v4 }
 0x95d   :  { %v542_v29 = vadd.f32 1e-12, %v540_v28 }
 0x95e   :  { %v554_v33 = vpop.permute.xlu0 %553 }
 0x95f   :  { %867 = vrsqrt.f32 %v542_v29 }
 0x962   :  { %v578_v45 = vpop.permute.xlu0 %577 }
 0x965   :  { %v866_v31 = vpop.eup %865 }
 0x966   :  { %v547_v32 = vmul.f32 %v866_v31, %v531_v15 }
 0x968   :  { %v552_v34 = vmul.f32 %v549_v30, %v547_v32 }
 0x969   :  { %v868_v35 = vpop.eup %867 }
 0x96a   :  { %v546_v36 = vmul.f32 %v868_v35, %v530_v19  ;;  %v557_v37 = vadd.f32 %v554_v33, %v552_v34 }
 0x96c   :  { %v551_v38 = vmul.f32 %v549_v30, %v546_v36  ;;  %v559_v40 = vrot.slane %v557_v37, 7 }
 0x96e   :  { %v556_v39 = vadd.f32 %v554_v33, %v551_v38 }
 0x970   :  { %v562_v41 = vsel %vm561_vm3, %v556_v39, %v559_v40 }
 0x971   :  { %v563_v42 = vpack.c.bf16 %v562_v41, %v562_v41 }
 0x973   :  { %816 = vmatmul.mubr.msk.bf16.vlgmr.msra.gmra.mrb[12].mxu0 %vm78_vm1, %v563_v42 }
 0x974   :  { %823 = vmatprep.mubr.msk.bf16.mxu0 %vm896_vm0, %v895_v0  ;;  %820 = vmatpush3.bf16.msra.mxu0 %v847_v43 }
 0x975   :  { %821 = vmatprep.subr.bf16.mxu0 %v895_v0  ;;  %v723_v0 = vld [vmem:[%s1118_s4 + $0x4] ss:$0 sm:$0xff] }
 0x978   :  { %822 = vmatpush3.bf16.msra.mxu0 %v848_v44 }
 0xa46   :  { %v617_v46 = vpop.f32.mrb[12].mxu0 }
 0xa47   :  { %v618_v47 = vadd.f32 %v617_v46, %v578_v45  ;;  %v817_v48 = vpop.f32.mrb[13].mxu0 }
 0xa48   :  { %v620_v49 = vpop.f32.mrb[14].mxu0 }
 0xa49   :  { %869 = vtanh.f32 %v618_v47  ;;  %v818_v50 = vpop.f32.mrb[15].mxu0 }
 0xa53   :  { %v870_v51 = vpop.eup %869 }
 0xa54   :  { %v624_v52 = vpack.c.bf16 %v870_v51, %v870_v51 }
 0xa56   :  { %824 = vmatmul.mubr.msk.bf16.vlgmr.msra.gmra.mrb[16].mxu0 %vm78_vm1, %v624_v52 }
 0xb29   :  { %v678_v53 = vpop.f32.mrb[16].mxu0 }
 0xb2a   :  { %v679_v54 = vadd.f32 %v723_v0, %v678_v53  ;;  %v825_v55 = vpop.f32.mrb[17].mxu0 }
 0xb2b   :  { %v681_v56 = vpop.f32.mrb[18].mxu0 }
 0xb2c   :  { %684 = vst [vmem:[#allocation2] sm:$0x3] %v679_v54  ;;  %v826_v57 = vpop.f32.mrb[19].mxu0 }
 0xb2d   :  { %882 = shalt.err (!%p879_p4)
}
 0xb2e   :  { %s883_s4 = scalar_lea.hbm %s1119_s5, 32 }
 0xb2f   :  { %p884_p5 = scmp.ne.s32.totalorder %s1119_s5, %s883_s4  ;;  %p887_p6 = scmp.lt.u32.totalorder %s883_s4, %s1119_s5 }
 0xb31   :  { %p889_p7 = pnand %p887_p6, %p884_p5 }
 0xb33   :  { %892 = shalt.err (!%p889_p7)
}
 0xb34   :  { %694 = dma.vmem_to_hbm [thread:$0]  %s692_s17, 32, %s1119_s5, [#allocation3]  }
 0xb35   :  { %893 = dma.done.wait [#allocation3], 32  }
 0xb36   :  { %894 = vsyncadd [#allocation3], 4294967264 }
 0xb37   :  { %698 = vsyncpa [#allocation3], 1 }

</bundles_post_ra>
